<compile_context>
chip_gen: v6e
topology: v6e:2x2x1
jax: 0.10.0
libtpu: 0.0.40
codegen_flags: <defaults>
</compile_context>

<pallas_src>
import math

import jax
import jax.numpy as jnp
from jax.experimental import pallas as pl
from jax.experimental.pallas import tpu as pltpu


def _proj_logsoftmax_kernel(x_ref, w_ref, b_ref, o_ref, acc_ref):
    # x_ref:  (TM, TK)     current token tile x K tile
    # w_ref:  (V,  TK)     full (padded) vocab rows x K tile
    # b_ref:  (1,  V)      bias (padded cols are -1e30 so they vanish in softmax)
    # o_ref:  (TM, V)      log-softmax output tile
    # acc_ref:(TM, V) f32  logits accumulator, resident across the K axis
    k = pl.program_id(1)

    @pl.when(k == 0)
    def _():
        acc_ref[...] = jnp.zeros_like(acc_ref)

    # x @ W^T on the MXU, accumulated in f32.
    acc_ref[...] += jax.lax.dot_general(
        x_ref[...], w_ref[...],
        dimension_numbers=(((1,), (1,)), ((), ())),
        preferred_element_type=jnp.float32,
    )

    @pl.when(k == pl.num_programs(1) - 1)
    def _():
        logits = acc_ref[...] + b_ref[...]                       # (TM, V)
        m = jnp.max(logits, axis=-1, keepdims=True)              # row max
        shifted = logits - m
        lse = jnp.log(jnp.sum(jnp.exp(shifted), axis=-1, keepdims=True))
        o_ref[...] = (shifted - lse).astype(o_ref.dtype)


def projection_layer(x: jax.Array, weight: jax.Array, bias: jax.Array,
                     *, tm: int = 128, tk: int = 512) -> jax.Array:
    """Equivalent of ProjectionLayer.forward: log_softmax(Linear(x), dim=-1)."""
    B, S, D = x.shape
    V, D_w = weight.shape
    assert D_w == D, "weight must be (vocab_size, d_model)"
    N = B * S

    def rup(a, m):
        return (a + m - 1) // m * m

    # --- pad to TPU-friendly tile sizes -----------------------------------
    tm = min(tm, rup(N, 8))          # token tile: multiple of 8 sublanes
    n_pad = rup(N, tm)
    d_pad = rup(D, 128)
    tk = min(tk, d_pad)
    while d_pad % tk != 0:           # tk, d_pad are multiples of 128
        tk -= 128
    v_pad = rup(V, 128)              # lane-dense output width

    x2 = x.reshape(N, D)
    x_p = jnp.zeros((n_pad, d_pad), x.dtype).at[:N, :D].set(x2)
    w_p = jnp.zeros((v_pad, d_pad), weight.dtype).at[:V, :D].set(weight)
    # Padded vocab columns get a huge negative bias so they contribute ~0 to
    # the softmax normalization (exp(-1e30 - max) == 0) and never win the max.
    b_p = jnp.full((1, v_pad), -1e30, dtype=jnp.float32)
    b_p = b_p.at[0, :V].set(bias.astype(jnp.float32))

    grid = (n_pad // tm, d_pad // tk)

    out = pl.pallas_call(
        _proj_logsoftmax_kernel,
        out_shape=jax.ShapeDtypeStruct((n_pad, v_pad), x.dtype),
        grid_spec=pltpu.PrefetchScalarGridSpec(
            num_scalar_prefetch=0,
            grid=grid,
            in_specs=[
                pl.BlockSpec((tm, tk), lambda i, k: (i, k)),       # x tile
                pl.BlockSpec((v_pad, tk), lambda i, k: (0, k)),    # W, tiled over K
                pl.BlockSpec((1, v_pad), lambda i, k: (0, 0)),     # bias
            ],
            out_specs=pl.BlockSpec((tm, v_pad), lambda i, k: (i, 0)),
            scratch_shapes=[pltpu.VMEM((tm, v_pad), jnp.float32)],
        ),
        compiler_params=pltpu.CompilerParams(
            # token-tile axis is fully independent -> megacore-shardable (v7x);
            # K axis carries the accumulator -> "arbitrary".
            dimension_semantics=("parallel", "arbitrary"),
            vmem_limit_bytes=64 << 20,
        ),
    )(x_p, w_p, b_p)

    return out[:N, :V].reshape(B, S, V)


if __name__ == "__main__":
    # Small deterministic setup consistent with ProjectionLayer(vocab_size, d_model)
    d_model = 128
    vocab_size = 256
    batch, seq = 2, 8

    key = jax.random.PRNGKey(0)
    k_x, k_w, k_b = jax.random.split(key, 3)

    x = jax.random.normal(k_x, (batch, seq, d_model), dtype=jnp.float32)
    # nn.Linear default init: U(-1/sqrt(in_features), 1/sqrt(in_features))
    bound = 1.0 / math.sqrt(d_model)
    weight = jax.random.uniform(k_w, (vocab_size, d_model),
                                minval=-bound, maxval=bound, dtype=jnp.float32)
    bias = jax.random.uniform(k_b, (vocab_size,),
                              minval=-bound, maxval=bound, dtype=jnp.float32)

    out = projection_layer(x, weight, bias)
    out = jax.block_until_ready(out)

    # Pure-JAX reference
    logits = jnp.dot(x, weight.T, precision=jax.lax.Precision.HIGHEST) + bias
    ref = jax.nn.log_softmax(logits, axis=-1)

    assert out.shape == (batch, seq, vocab_size)
    assert jnp.allclose(out, ref, atol=1e-3, rtol=1e-3), float(
        jnp.max(jnp.abs(out - ref)))

    print("KERNEL_OK")
</pallas_src>

<mosaic_0001>
module attributes {stable_mosaic.version = 11 : i64} {
  func.func @_proj_logsoftmax_kernel(%arg0: i32, %arg1: i32, %arg2: memref<16x128xf32, #tpu.memory_space<vmem>>, %arg3: memref<256x128xf32, #tpu.memory_space<vmem>>, %arg4: memref<1x256xf32, #tpu.memory_space<vmem>>, %arg5: memref<16x256xf32, #tpu.memory_space<vmem>>, %arg6: memref<16x256xf32, #tpu.memory_space<vmem>>) attributes {dimension_semantics = [#tpu.dimension_semantics<parallel>, #tpu.dimension_semantics<arbitrary>], iteration_bounds = array<i64: 1, 1>, scalar_prefetch = 0 : i64, scratch_operands = 1 : i64, tpu.core_type = #tpu.core_type<tc>, window_params = [{transform_indices = @transform_0, window_bounds = array<i64: 16, 128>}, {transform_indices = @transform_1, window_bounds = array<i64: 256, 128>}, {pipeline_mode = #tpu.pipeline_mode<synchronous>, transform_indices = @transform_2, window_bounds = array<i64: 1, 256>}, {transform_indices = @transform_3, window_bounds = array<i64: 16, 256>}]} {
    %c0_i32 = arith.constant 0 : i32
    %0 = arith.cmpi eq, %arg1, %c0_i32 : i32
    %1 = arith.extui %0 : i1 to i32
    %c0_i32_0 = arith.constant 0 : i32
    %2 = arith.cmpi ne, %1, %c0_i32_0 : i32
    scf.if %2 {
      %cst_10 = arith.constant 0.000000e+00 : f32
      %12 = vector.broadcast %cst_10 : f32 to vector<16x256xf32>
      %c0_11 = arith.constant 0 : index
      %c0_12 = arith.constant 0 : index
      %13 = vector.load %arg6[%c0_11, %c0_12] : memref<16x256xf32, #tpu.memory_space<vmem>>, vector<16x256xf32>
      tpu.vector_store %arg6[%c0_11, %c0_12], %12 {strides = array<i32>} : memref<16x256xf32, #tpu.memory_space<vmem>>, vector<16x256xf32>,
    } else {
    }
    %c0 = arith.constant 0 : index
    %c0_1 = arith.constant 0 : index
    %3 = vector.load %arg6[%c0, %c0_1] : memref<16x256xf32, #tpu.memory_space<vmem>>, vector<16x256xf32>
    %c0_2 = arith.constant 0 : index
    %c0_3 = arith.constant 0 : index
    %4 = vector.load %arg2[%c0_2, %c0_3] : memref<16x128xf32, #tpu.memory_space<vmem>>, vector<16x128xf32>
    %c0_4 = arith.constant 0 : index
    %c0_5 = arith.constant 0 : index
    %5 = vector.load %arg3[%c0_4, %c0_5] : memref<256x128xf32, #tpu.memory_space<vmem>>, vector<256x128xf32>
    %cst = arith.constant dense<0.000000e+00> : vector<16x256xf32>
    %6 = tpu.matmul %4, %5, %cst {dimension_numbers = #tpu.dot_dimension_numbers<[1], [1], [0], [0], [0, 0, 1, 0], [], []>} : vector<16x128xf32>, vector<256x128xf32>, vector<16x256xf32> -> vector<16x256xf32>
    %7 = arith.addf %3, %6 : vector<16x256xf32>
    %c0_6 = arith.constant 0 : index
    %c0_7 = arith.constant 0 : index
    %8 = vector.load %arg6[%c0_6, %c0_7] : memref<16x256xf32, #tpu.memory_space<vmem>>, vector<16x256xf32>
    tpu.vector_store %arg6[%c0_6, %c0_7], %7 {strides = array<i32>} : memref<16x256xf32, #tpu.memory_space<vmem>>, vector<16x256xf32>,
    %c0_i32_8 = arith.constant 0 : i32
    %9 = arith.cmpi eq, %arg1, %c0_i32_8 : i32
    %10 = arith.extui %9 : i1 to i32
    %c0_i32_9 = arith.constant 0 : i32
    %11 = arith.cmpi ne, %10, %c0_i32_9 : i32
    scf.if %11 {
      %c0_10 = arith.constant 0 : index
      %c0_11 = arith.constant 0 : index
      %12 = vector.load %arg6[%c0_10, %c0_11] : memref<16x256xf32, #tpu.memory_space<vmem>>, vector<16x256xf32>
      %c0_12 = arith.constant 0 : index
      %c0_13 = arith.constant 0 : index
      %13 = vector.load %arg4[%c0_12, %c0_13] : memref<1x256xf32, #tpu.memory_space<vmem>>, vector<1x256xf32>
      %14 = vector.broadcast %13 : vector<1x256xf32> to vector<16x256xf32>
      %15 = arith.addf %12, %14 : vector<16x256xf32>
      %cst_14 = arith.constant dense<0xFF800000> : vector<16xf32>
      %16 = vector.multi_reduction <maximumf>, %15, %cst_14 [1] : vector<16x256xf32> to vector<16xf32>
      %17 = vector.shape_cast %16 : vector<16xf32> to vector<16x1xf32>
      %18 = vector.broadcast %17 : vector<16x1xf32> to vector<16x256xf32>
      %19 = arith.subf %15, %18 : vector<16x256xf32>
      %20 = math.exp %19 : vector<16x256xf32>
      %cst_15 = arith.constant dense<0.000000e+00> : vector<16xf32>
      %21 = vector.multi_reduction <add>, %20, %cst_15 [1] : vector<16x256xf32> to vector<16xf32>
      %22 = vector.shape_cast %21 : vector<16xf32> to vector<16x1xf32>
      %23 = math.log %22 : vector<16x1xf32>
      %24 = vector.broadcast %23 : vector<16x1xf32> to vector<16x256xf32>
      %25 = arith.subf %19, %24 : vector<16x256xf32>
      %c0_16 = arith.constant 0 : index
      %c0_17 = arith.constant 0 : index
      %26 = vector.load %arg5[%c0_16, %c0_17] : memref<16x256xf32, #tpu.memory_space<vmem>>, vector<16x256xf32>
      tpu.vector_store %arg5[%c0_16, %c0_17], %25 {strides = array<i32>} : memref<16x256xf32, #tpu.memory_space<vmem>>, vector<16x256xf32>,
    } else {
    }
    return
  }
  func.func @transform_0(%arg0: i32, %arg1: i32) -> (i32, i32) {
    %c0_i32 = arith.constant 0 : i32
    return %arg0, %arg1 : i32, i32
  }
  func.func @transform_1(%arg0: i32, %arg1: i32) -> (i32, i32) {
    %c0_i32 = arith.constant 0 : i32
    %c0_i32_0 = arith.constant 0 : i32
    return %c0_i32, %arg1 : i32, i32
  }
  func.func @transform_2(%arg0: i32, %arg1: i32) -> (i32, i32) {
    %c0_i32 = arith.constant 0 : i32
    %c0_i32_0 = arith.constant 0 : i32
    %c0_i32_1 = arith.constant 0 : i32
    return %c0_i32, %c0_i32_0 : i32, i32
  }
  func.func @transform_3(%arg0: i32, %arg1: i32) -> (i32, i32) {
    %c0_i32 = arith.constant 0 : i32
    %c0_i32_0 = arith.constant 0 : i32
    return %arg0, %c0_i32 : i32, i32
  }
}

</mosaic_0001>

<bundles_post_ra>
// kernel: tpu_custom_call.1
= control target key start
LH: loop header
LB: loop body
LE: loop exit
PB: predicated region body
PF: predicated region fallthrough
CT: control target
= control target key end

     0   :  { %8 = vsyncpa [#allocation4], 0  ;;  %s451_s0 = inlined_call_operand.hbm [shape: f32[16,128], index: 0, kind: input, shape index: {}]   ;;  %s452_s1 = inlined_call_operand.hbm [shape: f32[256,128], index: 1, kind: input, shape index: {}]   ;;  %s453_s2 = inlined_call_operand.vmem [shape: f32[1,256], index: 2, kind: input, shape index: {}]   ;;  %s454_s3 = inlined_call_operand.hbm [shape: f32[16,256], index: 3, kind: output, shape index: {}]  }
   0x1   :  { %9 = vsyncpa [#allocation7], 0 }
   0x2   :  { %10 = vsyncpa [#allocation5], 0  ;;  %s404_s12 = smov [#allocation3]  }
   0x3   :  { %s16_s13 = sshll.u32 %s404_s12, 4  ;;  %s17_s13 = int_to_ptr.vmem [resolvable:$true] %s16_s13 }
   0x4   :  { %s346_s14 = scalar_lea.vmem %s17_s13, 256  ;;  %p351_p1 = scmp.lt.s32.totalorder %s17_s13, %s17_s13 }
   0x5   :  { %p347_p0 = scmp.ne.s32.totalorder %s17_s13, %s346_s14  ;;  %p352_p2 = scmp.lt.s32.totalorder %s346_s14, %s346_s14 }
   0x7   :  { %p353_p3 = por %p352_p2, %p351_p1 }
   0x9   :  { %p354_p4 = pnand %p353_p3, %p347_p0 }
   0xb   :  { %357 = shalt.err (!%p354_p4)
}
   0xc   :  { %s405_s15 = smov 128   ;;  %s406_s16 = smov 8  }
   0xd   :  { %22 = dma.hbm_to_vmem [thread:$0]  %s451_s0, 256, %s17_s13, [#allocation4], %s405_s15, %s405_s15, %s406_s16  }
   0xe   :  { %s407_s19 = smov [#allocation6]  }
   0xf   :  { %s28_s20 = sshll.u32 %s407_s19, 4  ;;  %s29_s20 = int_to_ptr.vmem [resolvable:$true] %s28_s20 }
  0x10   :  { %s366_s21 = scalar_lea.vmem %s29_s20, 4096  ;;  %p371_p6 = scmp.lt.s32.totalorder %s29_s20, %s29_s20 }
  0x11   :  { %p367_p5 = scmp.ne.s32.totalorder %s29_s20, %s366_s21  ;;  %p372_p7 = scmp.lt.s32.totalorder %s366_s21, %s366_s21 }
  0x13   :  { %p373_p8 = por %p372_p7, %p371_p6 }
  0x15   :  { %p374_p9 = pnand %p373_p8, %p367_p5 }
  0x17   :  { %377 = shalt.err (!%p374_p9)
}
  0x18   :  { %34 = dma.hbm_to_vmem [thread:$0]  %s452_s1, 4096, %s29_s20, [#allocation7], %s405_s15, %s405_s15, %s406_s16  }
  0x19   :  { %398 = dma.done.wait [#allocation4], 256  }
  0x1a   :  { %399 = vsyncadd [#allocation4], 4294967040 }
  0x1b   :  { %400 = dma.done.wait [#allocation7], 4096  }
  0x1c   :  { %401 = vsyncadd [#allocation7], 4294963200  ;;  %v88_v0 = vld [vmem:[#allocation6 + $0xf8] sm:$0xff]  ;;  %v87_v2 = vld [vmem:[#allocation6 + $0xf0] sm:$0xff]  ;;  %v183_v34 = vlaneseq }
  0x1d   :  { %v72_v1 = vld [vmem:[#allocation6 + $0x78] sm:$0xff]  ;;  %251 = vmatprep.subr.mxu0 %v88_v0  ;;  %287 = vmatprep.subr.mxu1 %v88_v0  ;;  %v71_v3 = vld [vmem:[#allocation6 + $0x70] sm:$0xff]  ;;  %v86_v4 = vld [vmem:[#allocation6 + $0xe8] sm:$0xff] }
  0x1e   :  { %252 = vmatpush3.xpose.msra.mxu0 %v72_v1  ;;  %303 = vmatpush3.xpose.msra.mxu1 %v72_v1  ;;  %v70_v5 = vld [vmem:[#allocation6 + $0x68] sm:$0xff]  ;;  %v85_v6 = vld [vmem:[#allocation6 + $0xe0] sm:$0xff]  ;;  %v437_v7 = vld [vmem:[#allocation3] sm:$0xff]  ;;  %v184_v35 = vshrl.u32 %v183_v34, 7 }
  0x1f   :  { %253 = vmatprep.subr.mxu0 %v87_v2  ;;  %288 = vmatprep.subr.mxu1 %v87_v2  ;;  %v69_v8 = vld [vmem:[#allocation6 + $0x60] sm:$0xff]  ;;  %v439_v9 = vld [vmem:[#allocation3 + $0x8] sm:$0xff]  ;;  %v83_v12 = vld [vmem:[#allocation6 + $0xd0] sm:$0xff] }
  0x20   :  { %v84_v10 = vld [vmem:[#allocation6 + $0xd8] sm:$0xff]  ;;  %283 = vmatprep.mubr.f32.mxu0 %v437_v7  ;;  %285 = vmatprep.mubr.f32.mxu1 %v439_v9  ;;  %v67_v13 = vld [vmem:[#allocation6 + $0x50] sm:$0xff]  ;;  %v82_v14 = vld [vmem:[#allocation6 + $0xc8] sm:$0xff]  ;;  %v185_v36 = vsub.s32 0, %v184_v35  ;;  %v189_v37 = vsub.s32 1, %v184_v35 }
  0x21   :  { %v68_v11 = vld [vmem:[#allocation6 + $0x58] sm:$0xff]  ;;  %v66_v15 = vld [vmem:[#allocation6 + $0x48] sm:$0xff]  ;;  %v81_v16 = vld [vmem:[#allocation6 + $0xc0] sm:$0xff] }
  0x22   :  { %254 = vmatpush3.xpose.msra.mxu0 %v71_v3  ;;  %304 = vmatpush3.xpose.msra.mxu1 %v71_v3  ;;  %v65_v17 = vld [vmem:[#allocation6 + $0x40] sm:$0xff]  ;;  %v80_v18 = vld [vmem:[#allocation6 + $0xb8] sm:$0xff]  ;;  %v79_v20 = vld [vmem:[#allocation6 + $0xb0] sm:$0xff] }
  0x23   :  { %255 = vmatprep.subr.mxu0 %v86_v4  ;;  %289 = vmatprep.subr.mxu1 %v86_v4  ;;  %v64_v19 = vld [vmem:[#allocation6 + $0x38] sm:$0xff]  ;;  %v63_v21 = vld [vmem:[#allocation6 + $0x30] sm:$0xff]  ;;  %v78_v22 = vld [vmem:[#allocation6 + $0xa8] sm:$0xff] }
  0x24   :  { %v62_v23 = vld [vmem:[#allocation6 + $0x28] sm:$0xff]  ;;  %v77_v24 = vld [vmem:[#allocation6 + $0xa0] sm:$0xff]  ;;  %v76_v26 = vld [vmem:[#allocation6 + $0x98] sm:$0xff] }
  0x25   :  { %v61_v25 = vld [vmem:[#allocation6 + $0x20] sm:$0xff]  ;;  %v60_v27 = vld [vmem:[#allocation6 + $0x18] sm:$0xff]  ;;  %v75_v28 = vld [vmem:[#allocation6 + $0x90] sm:$0xff] }
  0x26   :  { %256 = vmatpush3.xpose.msra.mxu0 %v70_v5  ;;  %305 = vmatpush3.xpose.msra.mxu1 %v70_v5  ;;  %v59_v29 = vld [vmem:[#allocation6 + $0x10] sm:$0xff]  ;;  %v74_v30 = vld [vmem:[#allocation6 + $0x88] sm:$0xff]  ;;  %v73_v32 = vld [vmem:[#allocation6 + $0x80] sm:$0xff] }
  0x27   :  { %257 = vmatprep.subr.mxu0 %v85_v6  ;;  %290 = vmatprep.subr.mxu1 %v85_v6  ;;  %v58_v31 = vld [vmem:[#allocation6 + $0x8] sm:$0xff]  ;;  %v57_v33 = vld [vmem:[#allocation6] sm:$0xff]  ;;  %v181_v38 = vld [vmem:[%s453_s2] sm:$0x3]  ;;  %s408_s2 = smov [#allocation8]  }
  0x28   :  { %v186_v39 = vrot.slane %v181_v38, %v185_v36  ;;  %v190_v40 = vrot.slane %v181_v38, %v189_v37  ;;  %s238_s24 = sshll.u32 %s408_s2, 4  ;;  %s239_s24 = int_to_ptr.vmem [resolvable:$true] %s238_s24 }
  0x29   :  { %s378_s25 = scalar_lea.vmem %s239_s24, 512  ;;  %p383_p11 = scmp.lt.s32.totalorder %s239_s24, %s239_s24 }
  0x2a   :  { %258 = vmatpush3.xpose.msra.mxu0 %v69_v8  ;;  %306 = vmatpush3.xpose.msra.mxu1 %v69_v8  ;;  %p379_p10 = scmp.ne.s32.totalorder %s239_s24, %s378_s25  ;;  %p384_p12 = scmp.lt.s32.totalorder %s378_s25, %s378_s25 }
  0x2b   :  { %259 = vmatprep.subr.mxu0 %v84_v10  ;;  %291 = vmatprep.subr.mxu1 %v84_v10 }
  0x2c   :  { %p385_p13 = por %p384_p12, %p383_p11 }
  0x2e   :  { %260 = vmatpush3.xpose.msra.mxu0 %v68_v11  ;;  %307 = vmatpush3.xpose.msra.mxu1 %v68_v11  ;;  %p386_p0 = pnand %p385_p13, %p379_p10 }
  0x2f   :  { %261 = vmatprep.subr.mxu0 %v83_v12  ;;  %292 = vmatprep.subr.mxu1 %v83_v12 }
  0x32   :  { %262 = vmatpush3.xpose.msra.mxu0 %v67_v13  ;;  %308 = vmatpush3.xpose.msra.mxu1 %v67_v13 }
  0x33   :  { %263 = vmatprep.subr.mxu0 %v82_v14  ;;  %293 = vmatprep.subr.mxu1 %v82_v14 }
  0x36   :  { %264 = vmatpush3.xpose.msra.mxu0 %v66_v15  ;;  %309 = vmatpush3.xpose.msra.mxu1 %v66_v15 }
  0x37   :  { %265 = vmatprep.subr.mxu0 %v81_v16  ;;  %294 = vmatprep.subr.mxu1 %v81_v16 }
  0x3a   :  { %266 = vmatpush3.xpose.msra.mxu0 %v65_v17  ;;  %310 = vmatpush3.xpose.msra.mxu1 %v65_v17 }
  0x3b   :  { %267 = vmatprep.subr.mxu0 %v80_v18  ;;  %295 = vmatprep.subr.mxu1 %v80_v18 }
  0x3e   :  { %268 = vmatpush3.xpose.msra.mxu0 %v64_v19  ;;  %311 = vmatpush3.xpose.msra.mxu1 %v64_v19 }
  0x3f   :  { %269 = vmatprep.subr.mxu0 %v79_v20  ;;  %296 = vmatprep.subr.mxu1 %v79_v20 }
  0x42   :  { %270 = vmatpush3.xpose.msra.mxu0 %v63_v21  ;;  %312 = vmatpush3.xpose.msra.mxu1 %v63_v21 }
  0x43   :  { %271 = vmatprep.subr.mxu0 %v78_v22  ;;  %297 = vmatprep.subr.mxu1 %v78_v22 }
  0x46   :  { %272 = vmatpush3.xpose.msra.mxu0 %v62_v23  ;;  %313 = vmatpush3.xpose.msra.mxu1 %v62_v23 }
  0x47   :  { %273 = vmatprep.subr.mxu0 %v77_v24  ;;  %298 = vmatprep.subr.mxu1 %v77_v24 }
  0x4a   :  { %274 = vmatpush3.xpose.msra.mxu0 %v61_v25  ;;  %314 = vmatpush3.xpose.msra.mxu1 %v61_v25 }
  0x4b   :  { %275 = vmatprep.subr.mxu0 %v76_v26  ;;  %299 = vmatprep.subr.mxu1 %v76_v26 }
  0x4e   :  { %276 = vmatpush3.xpose.msra.mxu0 %v60_v27  ;;  %315 = vmatpush3.xpose.msra.mxu1 %v60_v27 }
  0x4f   :  { %277 = vmatprep.subr.mxu0 %v75_v28  ;;  %300 = vmatprep.subr.mxu1 %v75_v28 }
  0x52   :  { %278 = vmatpush3.xpose.msra.mxu0 %v59_v29  ;;  %316 = vmatpush3.xpose.msra.mxu1 %v59_v29 }
  0x53   :  { %279 = vmatprep.subr.mxu0 %v74_v30  ;;  %301 = vmatprep.subr.mxu1 %v74_v30 }
  0x56   :  { %280 = vmatpush3.xpose.msra.mxu0 %v58_v31  ;;  %317 = vmatpush3.xpose.msra.mxu1 %v58_v31 }
  0x57   :  { %281 = vmatprep.subr.mxu0 %v73_v32  ;;  %302 = vmatprep.subr.mxu1 %v73_v32 }
  0x5a   :  { %282 = vmatpush3.xpose.msra.mxu0 %v57_v33  ;;  %318 = vmatpush3.xpose.msra.mxu1 %v57_v33 }
  0x5d   :  { %284 = vmatmul.mubr.f32.vlgmr.msra.gmra.mxu0 %v437_v7  ;;  %286 = vmatmul.mubr.f32.vlgmr.msra.gmra.mxu1 %v439_v9 }
 0x11d   :  { %v155_v41 = vpop.f32.mrf.mxu0  ;;  %v161_v42 = vpop.f32.mrf.mxu1 }
 0x11e   :  { %v193_v45 = vadd.f32 %v186_v39, %v155_v41  ;;  %v195_v47 = vadd.f32 %v186_v39, %v161_v42 }
 0x11f   :  { %v157_v43 = vpop.f32.mrf.mxu0  ;;  %v163_v44 = vpop.f32.mrf.mxu1 }
 0x120   :  { %v194_v46 = vadd.f32 %v190_v40, %v157_v43  ;;  %v196_v48 = vadd.f32 %v190_v40, %v163_v44 }
 0x122   :  { %v197_v49 = vmax.f32 %v193_v45, %v194_v46  ;;  %v200_v50 = vmax.f32 %v195_v47, %v196_v48 }
 0x124   :  { %198 = vmax.xlane.f32.xlu0 %v197_v49 }
 0x128   :  { %201 = vmax.xlane.f32.xlu0 %v200_v50 }
 0x1ad   :  { %v199_v51 = vpop.xlane.xlu0 %198 }
 0x1ae   :  { %v203_v52 = vsub.f32 %v193_v45, %v199_v51  ;;  %v204_v53 = vsub.f32 %v194_v46, %v199_v51 }
 0x1b0   :  { %v207_v54 = vmul.f32 1.442695, %v203_v52  ;;  %v209_v55 = vmul.f32 1.442695, %v204_v53 }
 0x1b1   :  { %v202_v56 = vpop.xlane.xlu0 %201 }
 0x1b2   :  { %326 = vpow2.f32 %v207_v54  ;;  %v205_v57 = vsub.f32 %v195_v47, %v202_v56  ;;  %v206_v58 = vsub.f32 %v196_v48, %v202_v56 }
 0x1b3   :  { %328 = vpow2.f32 %v209_v55 }
 0x1b4   :  { %v211_v59 = vmul.f32 1.442695, %v205_v57  ;;  %v213_v60 = vmul.f32 1.442695, %v206_v58 }
 0x1b6   :  { %330 = vpow2.f32 %v211_v59 }
 0x1b7   :  { %332 = vpow2.f32 %v213_v60 }
 0x1bf   :  { %v327_v61 = vpop.eup %326 }
 0x1c0   :  { %v329_v62 = vpop.eup %328 }
 0x1c1   :  { %v215_v63 = vadd.f32 %v329_v62, %v327_v61 }
 0x1c3   :  { %v331_v0 = vpop.eup %330  ;;  %216 = vadd.xlane.f32.xlu1 %v215_v63 }
 0x1c4   :  { %v333_v1 = vpop.eup %332 }
 0x1c5   :  { %v218_v2 = vadd.f32 %v333_v1, %v331_v0 }
 0x1c7   :  { %219 = vadd.xlane.f32.xlu1 %v218_v2 }
 0x24c   :  { %v217_v3 = vpop.xlane.xlu1 %216 }
 0x24d   :  { %334 = vlog2.f32 %v217_v3 }
 0x250   :  { %v220_v4 = vpop.xlane.xlu1 %219 }
 0x251   :  { %336 = vlog2.f32 %v220_v4 }
 0x25a   :  { %v335_v5 = vpop.eup %334 }
 0x25b   :  { %v222_v6 = vmul.f32 0.6931472, %v335_v5 }
 0x25d   :  { %v225_v7 = vsub.f32 %v203_v52, %v222_v6  ;;  %v226_v8 = vsub.f32 %v204_v53, %v222_v6 }
 0x25e   :  { %v337_v9 = vpop.eup %336 }
 0x25f   :  { %229 = vst [vmem:[#allocation8] sm:$0xff] %v225_v7  ;;  %230 = vst [vmem:[#allocation8 + $0x8] sm:$0xff] %v226_v8  ;;  %v224_v10 = vmul.f32 0.6931472, %v337_v9 }
 0x261   :  { %v227_v11 = vsub.f32 %v205_v57, %v224_v10  ;;  %v228_v12 = vsub.f32 %v206_v58, %v224_v10 }
 0x263   :  { %231 = vst [vmem:[#allocation8 + $0x10] sm:$0xff] %v227_v11  ;;  %232 = vst [vmem:[#allocation8 + $0x18] sm:$0xff] %v228_v12 }
 0x264   :  { %389 = shalt.err (!%p386_p0)
}
 0x265   :  { %s409_s26 = smov 256   ;;  %s410_s27 = smov 16  }
 0x266   :  { %244 = dma.vmem_to_hbm [thread:$0]  %s239_s24, 512, %s454_s3, [#allocation5], %s409_s26, %s409_s26, %s410_s27  }
 0x267   :  { %402 = dma.done.wait [#allocation5], 512  }
 0x268   :  { %403 = vsyncadd [#allocation5], 4294966784 }
 0x269   :  { %248 = vsyncpa [#allocation4], 1 }
 0x26a   :  { %249 = vsyncpa [#allocation7], 1 }
 0x26b   :  { %250 = vsyncpa [#allocation5], 1 }

</bundles_post_ra>
